<compile_context>
chip_gen: v6e
topology: v6e:2x2x1
jax: 0.10.0
libtpu: 0.0.40
codegen_flags: <defaults>
</compile_context>

<pallas_src>
import math
import functools

import jax
import jax.numpy as jnp
from jax import lax
from jax.experimental import pallas as pl
from jax.experimental.pallas import tpu as pltpu

_SQRT2 = math.sqrt(2.0)
_LRELU_SLOPE = 0.2


# ---------------------------------------------------------------------------
# Kernels
# ---------------------------------------------------------------------------

def _epilogue(acc_f32, b_ref, *, weight_gain, bias_gain, activation, has_bias, out_dtype):
    out = acc_f32 * weight_gain                       # scale O(M*N) accumulator, not weight tile
    if has_bias:
        out = out + b_ref[...].astype(jnp.float32) * bias_gain
    if activation == "lrelu":
        # leaky_relu(out, 0.2) * sqrt(2), folded into one select-of-scale.
        out = out * jnp.where(out >= 0.0, _SQRT2, _LRELU_SLOPE * _SQRT2)
    return out.astype(out_dtype)


def _fc_kernel_single(x_ref, w_ref, *rest, weight_gain, bias_gain, activation,
                      has_bias, matmul_precision):
    """Single K-step kernel: no accumulator scratch, result written straight to o_ref."""
    if has_bias:
        b_ref, o_ref = rest
    else:
        b_ref = None
        (o_ref,) = rest
    # x @ w.T as a contraction over the last axes (no in-kernel transpose), f32 accumulate.
    acc = lax.dot_general(
        x_ref[...], w_ref[...],
        dimension_numbers=(((1,), (1,)), ((), ())),
        preferred_element_type=jnp.float32,
        precision=matmul_precision,
    )
    o_ref[...] = _epilogue(acc, b_ref, weight_gain=weight_gain, bias_gain=bias_gain,
                           activation=activation, has_bias=has_bias, out_dtype=o_ref.dtype)


def _fc_kernel_acc(x_ref, w_ref, *rest, weight_gain, bias_gain, activation,
                   has_bias, matmul_precision):
    """Multi K-step kernel: f32 VMEM accumulator, init/finalize gated with pl.when."""
    if has_bias:
        b_ref, o_ref, acc_ref = rest
    else:
        b_ref = None
        o_ref, acc_ref = rest

    k = pl.program_id(2)

    @pl.when(k == 0)
    def _():
        acc_ref[...] = jnp.zeros_like(acc_ref)

    acc_ref[...] += lax.dot_general(
        x_ref[...], w_ref[...],
        dimension_numbers=(((1,), (1,)), ((), ())),
        preferred_element_type=jnp.float32,
        precision=matmul_precision,
    )

    @pl.when(k == pl.num_programs(2) - 1)
    def _():
        o_ref[...] = _epilogue(acc_ref[...], b_ref, weight_gain=weight_gain,
                               bias_gain=bias_gain, activation=activation,
                               has_bias=has_bias, out_dtype=o_ref.dtype)


# ---------------------------------------------------------------------------
# Tiling / wrapper
# ---------------------------------------------------------------------------

def _round_up(v, m):
    return (v + m - 1) // m * m


def _plan_dim(size, align, cap):
    """Return (tile, padded_size).

    If the whole dim fits under `cap`, it becomes one full block (no padding, even if
    unaligned — Pallas allows block == full array dim). Otherwise pad only to the next
    multiple of `align` and pick the largest align-multiple divisor of the padded size
    that is <= cap (so no padding beyond alignment is ever introduced).
    """
    if size <= cap:
        return size, size
    padded = _round_up(size, align)
    units = padded // align
    max_d = max(cap // align, 1)
    tile_units = 1
    for d in range(min(units, max_d), 0, -1):
        if units % d == 0:
            tile_units = d
            break
    return tile_units * align, padded


def _tpu_vmem_capacity_bytes():
    try:
        info = pltpu.get_tpu_info()
        cap = getattr(info, "vmem_capacity_bytes", None)
        if cap:
            return int(cap)
    except Exception:
        pass
    return 128 * 2**20  # assume a 128 MiB part if the query is unavailable


def fully_connected(x, weight, bias=None, *, activation="linear", lr_multiplier=1.0,
                    matmul_precision=lax.Precision.DEFAULT,
                    max_tm=None, max_tn=None, max_tk=None):
    """Pallas FullyConnectedLayer forward.

    x: [batch, in_features], weight: [out_features, in_features], bias: [out_features] or None.
    Note: for tiny layers plain XLA will beat a per-layer Pallas call; this kernel targets
    StyleGAN-scale shapes (512+ features, large batches).
    """
    if activation not in ("linear", "lrelu"):
        # TODO(synk): other bias_act modes (sigmoid, swish, custom gain/clamp) not implemented.
        raise ValueError(f"unsupported activation: {activation}")

    M, K = x.shape
    N, K2 = weight.shape
    assert K == K2, (x.shape, weight.shape)
    weight_gain = lr_multiplier / math.sqrt(K)
    bias_gain = lr_multiplier
    has_bias = bias is not None

    # ---- per-generation VMEM budget & tile caps ------------------------------------
    vmem_cap = _tpu_vmem_capacity_bytes()
    if vmem_cap <= 64 * 2**20:          # v7x-class: 64 MiB VMEM per TC, 2 TCs/chip
        vmem_limit = 48 * 2**20
        tm_cap, tn_cap, tk_cap = 256, 512, 1024
        two_cores = True
    else:                                # v5e / v6e: 128 MiB VMEM, 1 TC
        vmem_limit = 100 * 2**20
        tm_cap, tn_cap, tk_cap = 512, 1024, 2048
        two_cores = False
    if max_tm is not None:
        tm_cap = max_tm
    if max_tn is not None:
        tn_cap = max_tn
    if max_tk is not None:
        tk_cap = max_tk

    # ---- tile plan: minimal padding, (8,128)-legal blocks ----------------------------
    tm, Mp = _plan_dim(M, 8, tm_cap)
    tn, Np = _plan_dim(N, 128, tn_cap)
    tk, Kp = _plan_dim(K, 128, tk_cap)

    # v7x: make sure both TensorCores get a parallel block (only when alignment allows).
    if two_cores and (Mp // tm) * (Np // tn) == 1:
        if tn % 256 == 0:
            tn //= 2
        elif tm % 16 == 0:
            tm //= 2

    # ---- operand padding (only when a dim is actually split) ------------------------
    xp = jnp.pad(x, ((0, Mp - M), (0, Kp - K))) if (Mp != M or Kp != K) else x
    wp = jnp.pad(weight, ((0, Np - N), (0, Kp - K))) if (Np != N or Kp != K) else weight
    if has_bias:
        b2d = bias.reshape(1, N)
        bp = jnp.pad(b2d, ((0, 0), (0, Np - N))) if Np != N else b2d

    kt = Kp // tk
    single_k = (kt == 1)

    itemsize = jnp.dtype(x.dtype).itemsize
    bytes_accessed = (xp.size * jnp.dtype(xp.dtype).itemsize
                      + wp.size * jnp.dtype(wp.dtype).itemsize
                      + (bp.size * jnp.dtype(bp.dtype).itemsize if has_bias else 0)
                      + Mp * Np * itemsize)
    cost = pl.CostEstimate(flops=2 * Mp * Np * Kp, transcendentals=0,
                           bytes_accessed=bytes_accessed)

    common = dict(weight_gain=weight_gain, bias_gain=bias_gain, activation=activation,
                  has_bias=has_bias, matmul_precision=matmul_precision)

    if single_k:
        kernel = functools.partial(_fc_kernel_single, **common)
        grid = (Mp // tm, Np // tn)
        in_specs = [
            pl.BlockSpec((tm, tk), lambda i, j: (i, 0)),          # x
            pl.BlockSpec((tn, tk), lambda i, j: (j, 0)),          # weight (row-major, no .T)
        ]
        if has_bias:
            in_specs.append(pl.BlockSpec((1, tn), lambda i, j: (0, j)))
        out_specs = pl.BlockSpec((tm, tn), lambda i, j: (i, j))
        scratch_shapes = []
        dim_sem = ("parallel", "parallel")
    else:
        kernel = functools.partial(_fc_kernel_acc, **common)
        grid = (Mp // tm, Np // tn, kt)
        in_specs = [
            pl.BlockSpec((tm, tk), lambda i, j, k: (i, k)),       # x
            pl.BlockSpec((tn, tk), lambda i, j, k: (j, k)),       # weight
        ]
        if has_bias:
            in_specs.append(pl.BlockSpec((1, tn), lambda i, j, k: (0, j)))
        out_specs = pl.BlockSpec((tm, tn), lambda i, j, k: (i, j))
        scratch_shapes = [pltpu.VMEM((tm, tn), jnp.float32)]      # f32 accumulator
        dim_sem = ("parallel", "parallel", "arbitrary")

    operands = [xp, wp] + ([bp] if has_bias else [])

    out_padded = pl.pallas_call(
        kernel,
        out_shape=jax.ShapeDtypeStruct((Mp, Np), x.dtype),
        grid_spec=pltpu.PrefetchScalarGridSpec(
            num_scalar_prefetch=0,
            grid=grid,
            in_specs=in_specs,
            out_specs=out_specs,
            scratch_shapes=scratch_shapes,
        ),
        compiler_params=pltpu.CompilerParams(
            dimension_semantics=dim_sem,
            vmem_limit_bytes=vmem_limit,
        ),
        cost_estimate=cost,
    )(*operands)

    if Mp != M or Np != N:
        out_padded = out_padded[:M, :N]
    return out_padded


def fully_connected_ref(x, weight, bias=None, *, activation="linear", lr_multiplier=1.0):
    """Pure-JAX reference (mirrors the PyTorch forward)."""
    K = x.shape[-1]
    weight_gain = lr_multiplier / math.sqrt(K)
    bias_gain = lr_multiplier
    w = weight.astype(x.dtype) * weight_gain
    out = jnp.matmul(x, w.T, precision=lax.Precision.HIGHEST)
    if bias is not None:
        out = out + bias.astype(x.dtype) * bias_gain
    if activation == "lrelu":
        out = jnp.where(out >= 0, out, _LRELU_SLOPE * out) * _SQRT2
    return out


if __name__ == "__main__":
    key = jax.random.PRNGKey(0)

    # (batch, fin, fout, act, lr_mul, use_bias, precision, tile_overrides, tol)
    HIGH = lax.Precision.HIGHEST
    DEF = lax.Precision.DEFAULT
    configs = [
        (16, 128, 128, "linear", 1.0, True, HIGH, {}, 1e-4),    # aligned, addmm path
        (16, 128, 128, "lrelu", 0.01, True, HIGH, {}, 1e-4),    # mapping-network lr_mul
        (10, 96, 80, "lrelu", 1.0, True, HIGH, {}, 1e-4),       # unaligned dims, full-block / no pad
        (10, 96, 80, "linear", 1.0, False, HIGH, {}, 1e-4),     # no bias operand at all
        (16, 640, 256, "lrelu", 1.0, True, HIGH, {}, 1e-4),     # K=640: single K block, no padding
        (16, 512, 256, "lrelu", 1.0, True, HIGH,                # force the multi-K accumulator path
         {"max_tk": 128, "max_tn": 128}, 1e-4),
        (16, 512, 512, "lrelu", 1.0, True, DEF, {}, 5e-2),      # fast default precision (bf16 pass)
    ]

    for idx, (B, fin, fout, act, lr_mul, use_bias, prec, overrides, tol) in enumerate(configs):
        key, kx, kw = jax.random.split(key, 3)
        weight_init = 1.0
        bias_init = 0.1

        x = jax.random.normal(kx, (B, fin), dtype=jnp.float32)
        # torch.randn([out, in]) * (weight_init / lr_multiplier)
        weight = jax.random.normal(kw, (fout, fin), dtype=jnp.float32) * (weight_init / lr_mul)
        # np.broadcast_to(bias_init, [out]) / lr_multiplier
        bias = jnp.full((fout,), bias_init / lr_mul, dtype=jnp.float32) if use_bias else None

        out = fully_connected(x, weight, bias, activation=act, lr_multiplier=lr_mul,
                              matmul_precision=prec, **overrides)
        out = jax.block_until_ready(out)
        ref = fully_connected_ref(x, weight, bias, activation=act, lr_multiplier=lr_mul)

        assert out.shape == (B, fout), (idx, out.shape)
        err = float(jnp.max(jnp.abs(out - ref)))
        assert err < tol, f"config {idx} mismatch, max err {err}"

    print("KERNEL_OK")
</pallas_src>

<mosaic_0001>
module attributes {stable_mosaic.version = 11 : i64} {
  func.func @_fc_kernel_single(%arg0: i32, %arg1: i32, %arg2: memref<16x128xf32, #tpu.memory_space<vmem>>, %arg3: memref<128x128xf32, #tpu.memory_space<vmem>>, %arg4: memref<1x128xf32, #tpu.memory_space<vmem>>, %arg5: memref<16x128xf32, #tpu.memory_space<vmem>>) attributes {dimension_semantics = [#tpu.dimension_semantics<parallel>, #tpu.dimension_semantics<parallel>], iteration_bounds = array<i64: 1, 1>, scalar_prefetch = 0 : i64, scratch_operands = 0 : i64, tpu.core_type = #tpu.core_type<tc>, window_params = [{transform_indices = @transform_0, window_bounds = array<i64: 16, 128>}, {transform_indices = @transform_1, window_bounds = array<i64: 128, 128>}, {transform_indices = @transform_2, window_bounds = array<i64: 1, 128>}, {transform_indices = @transform_3, window_bounds = array<i64: 16, 128>}]} {
    %c0 = arith.constant 0 : index
    %c0_0 = arith.constant 0 : index
    %0 = vector.load %arg2[%c0, %c0_0] : memref<16x128xf32, #tpu.memory_space<vmem>>, vector<16x128xf32>
    %c0_1 = arith.constant 0 : index
    %c0_2 = arith.constant 0 : index
    %1 = vector.load %arg3[%c0_1, %c0_2] : memref<128x128xf32, #tpu.memory_space<vmem>>, vector<128x128xf32>
    %cst = arith.constant dense<0.000000e+00> : vector<16x128xf32>
    %2 = tpu.matmul %0, %1, %cst {dimension_numbers = #tpu.dot_dimension_numbers<[1], [1], [0], [0], [0, 0, 1, 0], [], []>, precision = #tpu.contract_precision<fp32>} : vector<16x128xf32>, vector<128x128xf32>, vector<16x128xf32> -> vector<16x128xf32>
    %cst_3 = arith.constant 0.0883883461 : f32
    %3 = vector.broadcast %cst_3 : f32 to vector<16x128xf32>
    %4 = arith.mulf %2, %3 : vector<16x128xf32>
    %c0_4 = arith.constant 0 : index
    %c0_5 = arith.constant 0 : index
    %5 = vector.load %arg4[%c0_4, %c0_5] : memref<1x128xf32, #tpu.memory_space<vmem>>, vector<1x128xf32>
    %cst_6 = arith.constant 1.000000e+00 : f32
    %6 = vector.broadcast %cst_6 : f32 to vector<1x128xf32>
    %7 = arith.mulf %5, %6 : vector<1x128xf32>
    %8 = vector.broadcast %7 : vector<1x128xf32> to vector<16x128xf32>
    %9 = arith.addf %4, %8 : vector<16x128xf32>
    %c0_7 = arith.constant 0 : index
    %c0_8 = arith.constant 0 : index
    %10 = vector.load %arg5[%c0_7, %c0_8] : memref<16x128xf32, #tpu.memory_space<vmem>>, vector<16x128xf32>
    tpu.vector_store %arg5[%c0_7, %c0_8], %9 {strides = array<i32>} : memref<16x128xf32, #tpu.memory_space<vmem>>, vector<16x128xf32>,
    return
  }
  func.func @transform_0(%arg0: i32, %arg1: i32) -> (i32, i32) {
    %c0_i32 = arith.constant 0 : i32
    %c0_i32_0 = arith.constant 0 : i32
    return %arg0, %c0_i32 : i32, i32
  }
  func.func @transform_1(%arg0: i32, %arg1: i32) -> (i32, i32) {
    %c0_i32 = arith.constant 0 : i32
    %c0_i32_0 = arith.constant 0 : i32
    return %arg1, %c0_i32 : i32, i32
  }
  func.func @transform_2(%arg0: i32, %arg1: i32) -> (i32, i32) {
    %c0_i32 = arith.constant 0 : i32
    %c0_i32_0 = arith.constant 0 : i32
    return %c0_i32, %arg1 : i32, i32
  }
  func.func @transform_3(%arg0: i32, %arg1: i32) -> (i32, i32) {
    %c0_i32 = arith.constant 0 : i32
    return %arg0, %arg1 : i32, i32
  }
}

</mosaic_0001>

<bundles_post_ra>
// kernel: tpu_custom_call.1
= control target key start
LH: loop header
LB: loop body
LE: loop exit
PB: predicated region body
PF: predicated region fallthrough
CT: control target
= control target key end

     0   :  { %8 = vsyncpa [#allocation3], 0  ;;  %s1562_s0 = inlined_call_operand.hbm [shape: f32[16,128], index: 0, kind: input, shape index: {}]   ;;  %s1563_s1 = inlined_call_operand.hbm [shape: f32[128,128], index: 1, kind: input, shape index: {}]   ;;  %s1564_s2 = inlined_call_operand.vmem [shape: f32[1,128], index: 2, kind: input, shape index: {}]   ;;  %s1565_s3 = inlined_call_operand.hbm [shape: f32[16,128], index: 3, kind: output, shape index: {}]  }
   0x1   :  { %9 = vsyncpa [#allocation6], 0 }
   0x2   :  { %10 = vsyncpa [#allocation4], 0  ;;  %s1166_s12 = smov [#allocation2]  }
   0x3   :  { %s16_s13 = sshll.u32 %s1166_s12, 4  ;;  %s17_s13 = int_to_ptr.vmem [resolvable:$true] %s16_s13 }
   0x4   :  { %s1108_s14 = scalar_lea.vmem %s17_s13, 256  ;;  %p1113_p1 = scmp.lt.s32.totalorder %s17_s13, %s17_s13 }
   0x5   :  { %p1109_p0 = scmp.ne.s32.totalorder %s17_s13, %s1108_s14  ;;  %p1114_p2 = scmp.lt.s32.totalorder %s1108_s14, %s1108_s14 }
   0x7   :  { %p1115_p3 = por %p1114_p2, %p1113_p1 }
   0x9   :  { %p1116_p4 = pnand %p1115_p3, %p1109_p0 }
   0xb   :  { %1119 = shalt.err (!%p1116_p4)
}
   0xc   :  { %s1167_s15 = smov 128   ;;  %s1168_s16 = smov 8  }
   0xd   :  { %22 = dma.hbm_to_vmem [thread:$0]  %s1562_s0, 256, %s17_s13, [#allocation3], %s1167_s15, %s1167_s15, %s1168_s16  }
   0xe   :  { %s1169_s19 = smov [#allocation5]  }
   0xf   :  { %s28_s20 = sshll.u32 %s1169_s19, 4  ;;  %s29_s20 = int_to_ptr.vmem [resolvable:$true] %s28_s20 }
  0x10   :  { %s1128_s21 = scalar_lea.vmem %s29_s20, 2048  ;;  %p1133_p6 = scmp.lt.s32.totalorder %s29_s20, %s29_s20 }
  0x11   :  { %p1129_p5 = scmp.ne.s32.totalorder %s29_s20, %s1128_s21  ;;  %p1134_p7 = scmp.lt.s32.totalorder %s1128_s21, %s1128_s21 }
  0x13   :  { %p1135_p8 = por %p1134_p7, %p1133_p6 }
  0x15   :  { %p1136_p9 = pnand %p1135_p8, %p1129_p5 }
  0x17   :  { %1139 = shalt.err (!%p1136_p9)
}
  0x18   :  { %34 = dma.hbm_to_vmem [thread:$0]  %s1563_s1, 2048, %s29_s20, [#allocation6], %s1167_s15, %s1167_s15, %s1168_s16  }
  0x19   :  { %1160 = dma.done.wait [#allocation3], 256  }
  0x1a   :  { %1161 = vsyncadd [#allocation3], 4294967040 }
  0x1b   :  { %1162 = dma.done.wait [#allocation6], 2048  }
  0x1c   :  { %1163 = vsyncadd [#allocation6], 4294965248  ;;  %v60_v0 = vld [vmem:[#allocation5 + $0x78] sm:$0xff]  ;;  %v59_v1 = vld [vmem:[#allocation5 + $0x70] sm:$0xff]  ;;  %s1170_s24 = smov [#allocation7]  }
  0x1d   :  { %v58_v2 = vld [vmem:[#allocation5 + $0x68] sm:$0xff]  ;;  %v1203_v3 = vand.u32 4294901760, %v60_v0  ;;  %v1205_v4 = vand.u32 4294901760, %v59_v1  ;;  %v57_v6 = vld [vmem:[#allocation5 + $0x60] sm:$0xff]  ;;  %v56_v7 = vld [vmem:[#allocation5 + $0x58] sm:$0xff]  ;;  %s763_s25 = sshll.u32 %s1170_s24, 4  ;;  %s764_s25 = int_to_ptr.vmem [resolvable:$true] %s763_s25 }
  0x1e   :  { %v1207_v5 = vand.u32 4294901760, %v58_v2  ;;  %v1209_v8 = vand.u32 4294901760, %v57_v6  ;;  %v1222_v12 = vand.u32 4294901760, %v56_v7  ;;  %v55_v16 = vld [vmem:[#allocation5 + $0x50] sm:$0xff]  ;;  %v54_v26 = vld [vmem:[#allocation5 + $0x48] sm:$0xff]  ;;  %v53_v31 = vld [vmem:[#allocation5 + $0x40] sm:$0xff]  ;;  %p1145_p11 = scmp.lt.s32.totalorder %s764_s25, %s764_s25 }
  0x1f   :  { %885 = vmatprep.subr.mxu0 %v1203_v3  ;;  %v1213_v9 = vsub.f32 %v60_v0, %v1203_v3  ;;  %v1216_v10 = vsub.f32 %v59_v1, %v1205_v4  ;;  %v1242_v20 = vand.u32 4294901760, %v55_v16  ;;  %v1254_v27 = vand.u32 4294901760, %v54_v26  ;;  %v43_v33 = vld [vmem:[#allocation2] sm:$0xff]  ;;  %v52_v39 = vld [vmem:[#allocation5 + $0x38] sm:$0xff]  ;;  %v50_v55 = vld [vmem:[#allocation5 + $0x28] sm:$0xff]  ;;  %s1140_s26 = scalar_lea.vmem %s764_s25, 256 }
  0x20   :  { %v1219_v11 = vsub.f32 %v58_v2, %v1207_v5  ;;  %886 = vmatpush3.xpose.msra.mxu0 %v1203_v3  ;;  %v1235_v17 = vsub.f32 %v57_v6, %v1209_v8  ;;  %v1245_v21 = vsub.f32 %v56_v7, %v1222_v12  ;;  %v1266_v34 = vand.u32 4294901760, %v53_v31  ;;  %v51_v47 = vld [vmem:[#allocation5 + $0x30] sm:$0xff]  ;;  %v49_v61 = vld [vmem:[#allocation5 + $0x20] sm:$0xff]  ;;  %v48_v6 = vld [vmem:[#allocation5 + $0x18] sm:$0xff]  ;;  %p1141_p10 = scmp.ne.s32.totalorder %s764_s25, %s1140_s26  ;;  %p1146_p12 = scmp.lt.s32.totalorder %s1140_s26, %s1140_s26 }
  0x21   :  { %887 = vmatprep.subr.mxu0 %v1205_v4  ;;  %v1226_v13 = vand.u32 4294901760, %v1213_v9  ;;  %v1229_v14 = vand.u32 4294901760, %v1216_v10  ;;  %v1263_v32 = vsub.f32 %v55_v16, %v1242_v20  ;;  %v1268_v35 = vand.u32 4294901760, %v43_v33 }
  0x22   :  { %v1232_v15 = vand.u32 4294901760, %v1219_v11  ;;  %v1251_v25 = vand.u32 4294901760, %v1235_v17  ;;  %v1260_v30 = vand.u32 4294901760, %v1245_v21  ;;  %v1277_v40 = vsub.f32 %v54_v26, %v1254_v27  ;;  %p1147_p13 = por %p1146_p12, %p1145_p11 }
  0x23   :  { %v166_v18 = vsub.f32 %v1213_v9, %v1226_v13  ;;  %v173_v19 = vsub.f32 %v1216_v10, %v1229_v14  ;;  %v1274_v38 = vand.u32 4294901760, %v1263_v32  ;;  %v1280_v41 = vsub.f32 %v43_v33, %v1268_v35  ;;  %952 = vmatprep.mubr.f32.mxu1 %v1268_v35  ;;  %v46_v33 = vld [vmem:[#allocation5 + $0x8] sm:$0xff] }
  0x24   :  { %888 = vmatpush3.xpose.msra.mxu0 %v1205_v4  ;;  %v180_v24 = vsub.f32 %v1219_v11, %v1232_v15  ;;  %v187_v29 = vsub.f32 %v1235_v17, %v1251_v25  ;;  %v194_v37 = vsub.f32 %v1245_v21, %v1260_v30  ;;  %v1284_v42 = vand.u32 4294901760, %v52_v39  ;;  %p1148_p0 = pnand %p1147_p13, %p1141_p10 }
  0x25   :  { %889 = vmatprep.subr.mxu0 %v1207_v5  ;;  %v167_v22 = vand.u32 4294901760, %v166_v18  ;;  %v174_v23 = vand.u32 4294901760, %v173_v19  ;;  %v144_v43 = vand.u32 4294901760, %v1280_v41  ;;  %v201_v45 = vsub.f32 %v1263_v32, %v1274_v38 }
  0x26   :  { %v181_v28 = vand.u32 4294901760, %v180_v24  ;;  %v188_v36 = vand.u32 4294901760, %v187_v29  ;;  %v195_v44 = vand.u32 4294901760, %v194_v37  ;;  %v1291_v46 = vand.u32 4294901760, %v1277_v40 }
  0x27   :  { %920 = vmatprep.subr.mxu1 %v167_v22  ;;  %v1294_v48 = vsub.f32 %v53_v31, %v1266_v34  ;;  %v145_v49 = vsub.f32 %v1280_v41, %v144_v43  ;;  %v1300_v50 = vand.u32 4294901760, %v51_v47  ;;  %v202_v52 = vand.u32 4294901760, %v201_v45 }
  0x28   :  { %890 = vmatpush3.xpose.msra.mxu0 %v1207_v5  ;;  %921 = vmatpush3.xpose.msra.mxu1 %v167_v22  ;;  %v208_v53 = vsub.f32 %v1277_v40, %v1291_v46  ;;  %v1309_v56 = vsub.f32 %v52_v39, %v1284_v42  ;;  %v1312_v57 = vand.u32 4294901760, %v50_v55  ;;  %v1324_v63 = vand.u32 4294901760, %v49_v61  ;;  %v44_v39 = vld [vmem:[#allocation2 + $0x8] sm:$0xff] }
  0x29   :  { %891 = vmatprep.subr.mxu0 %v1209_v8  ;;  %922 = vmatprep.subr.mxu1 %v174_v23  ;;  %v146_v51 = vand.u32 4294901760, %v145_v49  ;;  %v1306_v54 = vand.u32 4294901760, %v1294_v48  ;;  %v1321_v62 = vsub.f32 %v51_v47, %v1300_v50  ;;  %v1336_v16 = vand.u32 4294901760, %v48_v6  ;;  %v45_v49 = vld [vmem:[#allocation5] sm:$0xff] }
  0x2a   :  { %v209_v58 = vand.u32 4294901760, %v208_v53  ;;  %v1318_v60 = vand.u32 4294901760, %v1309_v56  ;;  %v1333_v7 = vsub.f32 %v50_v55, %v1312_v57  ;;  %v1345_v24 = vsub.f32 %v49_v61, %v1324_v63 }
  0x2b   :  { %917 = vmatprep.mubr.f32.mxu0 %v146_v51  ;;  %v215_v59 = vsub.f32 %v1294_v48, %v1306_v54  ;;  %v1330_v2 = vand.u32 4294901760, %v1321_v62  ;;  %v1360_v37 = vand.u32 4294901760, %v46_v33  ;;  %v1374_v53 = vand.u32 4294901760, %v45_v49 }
  0x2c   :  { %892 = vmatpush3.xpose.msra.mxu0 %v1209_v8  ;;  %923 = vmatpush3.xpose.msra.mxu1 %v174_v23  ;;  %v222_v1 = vsub.f32 %v1309_v56, %v1318_v60  ;;  %v1342_v22 = vand.u32 4294901760, %v1333_v7  ;;  %v47_v23 = vld [vmem:[#allocation5 + $0x10] sm:$0xff]  ;;  %v1354_v31 = vand.u32 4294901760, %v1345_v24 }
  0x2d   :  { %893 = vmatprep.subr.mxu0 %v1222_v12  ;;  %924 = vmatprep.subr.mxu1 %v181_v28  ;;  %v216_v0 = vand.u32 4294901760, %v215_v59  ;;  %v229_v19 = vsub.f32 %v1321_v62, %v1330_v2  ;;  %v1348_v26 = vand.u32 4294901760, %v47_v23  ;;  %v1383_v61 = vsub.f32 %v46_v33, %v1360_v37 }
  0x2e   :  { %v223_v18 = vand.u32 4294901760, %v222_v1  ;;  %v236_v29 = vsub.f32 %v1333_v7, %v1342_v22  ;;  %v243_v45 = vsub.f32 %v1345_v24, %v1354_v31 }
  0x2f   :  { %v1369_v51 = vsub.f32 %v47_v23, %v1348_v26 }
  0x30   :  { %894 = vmatpush3.xpose.msra.mxu0 %v1222_v12  ;;  %925 = vmatpush3.xpose.msra.mxu1 %v181_v28  ;;  %v230_v28 = vand.u32 4294901760, %v229_v19  ;;  %v244_v55 = vand.u32 4294901760, %v243_v45  ;;  %v1396_v19 = vsub.f32 %v45_v49, %v1374_v53 }
  0x31   :  { %895 = vmatprep.subr.mxu0 %v1242_v20  ;;  %926 = vmatprep.subr.mxu1 %v188_v36  ;;  %v1380_v59 = vand.u32 4294901760, %v1369_v51 }
  0x32   :  { %v1404_v33 = vand.u32 4294901760, %v1396_v19 }
  0x34   :  { %896 = vmatpush3.xpose.msra.mxu0 %v1242_v20  ;;  %927 = vmatpush3.xpose.msra.mxu1 %v188_v36  ;;  %v1357_v36 = vsub.f32 %v48_v6, %v1336_v16  ;;  %v257_v6 = vsub.f32 %v1369_v51, %v1380_v59  ;;  %v271_v45 = vsub.f32 %v1396_v19, %v1404_v33 }
  0x35   :  { %897 = vmatprep.subr.mxu0 %v1254_v27  ;;  %928 = vmatprep.subr.mxu1 %v195_v44 }
  0x36   :  { %v1366_v47 = vand.u32 4294901760, %v1357_v36 }
  0x38   :  { %898 = vmatpush3.xpose.msra.mxu0 %v1254_v27  ;;  %929 = vmatpush3.xpose.msra.mxu1 %v195_v44  ;;  %v237_v44 = vand.u32 4294901760, %v236_v29 }
  0x39   :  { %899 = vmatprep.subr.mxu0 %v1266_v34  ;;  %930 = vmatprep.subr.mxu1 %v202_v52 }
  0x3c   :  { %900 = vmatpush3.xpose.msra.mxu0 %v1266_v34  ;;  %931 = vmatpush3.xpose.msra.mxu1 %v202_v52  ;;  %v1371_v52 = vand.u32 4294901760, %v44_v39 }
  0x3d   :  { %901 = vmatprep.subr.mxu0 %v1284_v42  ;;  %932 = vmatprep.subr.mxu1 %v209_v58 }
  0x40   :  { %902 = vmatpush3.xpose.msra.mxu0 %v1284_v42  ;;  %933 = vmatpush3.xpose.msra.mxu1 %v209_v58  ;;  %v250_v58 = vsub.f32 %v1357_v36, %v1366_v47 }
  0x41   :  { %903 = vmatprep.subr.mxu0 %v1300_v50  ;;  %934 = vmatprep.subr.mxu1 %v216_v0 }
  0x42   :  { %v251_v1 = vand.u32 4294901760, %v250_v58 }
  0x44   :  { %904 = vmatpush3.xpose.msra.mxu0 %v1300_v50  ;;  %935 = vmatpush3.xpose.msra.mxu1 %v216_v0  ;;  %v1386_v0 = vsub.f32 %v44_v39, %v1371_v52 }
  0x45   :  { %905 = vmatprep.subr.mxu0 %v1312_v57  ;;  %936 = vmatprep.subr.mxu1 %v223_v18 }
  0x46   :  { %v154_v23 = vand.u32 4294901760, %v1386_v0 }
  0x48   :  { %906 = vmatpush3.xpose.msra.mxu0 %v1312_v57  ;;  %937 = vmatpush3.xpose.msra.mxu1 %v223_v18  ;;  %v1393_v18 = vand.u32 4294901760, %v1383_v61  ;;  %v155_v39 = vsub.f32 %v1386_v0, %v154_v23 }
  0x49   :  { %907 = vmatprep.subr.mxu0 %v1324_v63  ;;  %938 = vmatprep.subr.mxu1 %v230_v28 }
  0x4a   :  { %v264_v29 = vsub.f32 %v1383_v61, %v1393_v18  ;;  %v156_v49 = vand.u32 4294901760, %v155_v39 }
  0x4c   :  { %908 = vmatpush3.xpose.msra.mxu0 %v1324_v63  ;;  %939 = vmatpush3.xpose.msra.mxu1 %v230_v28  ;;  %v258_v28 = vand.u32 4294901760, %v257_v6 }
  0x4d   :  { %909 = vmatprep.subr.mxu0 %v1336_v16  ;;  %940 = vmatprep.subr.mxu1 %v237_v44 }
  0x50   :  { %910 = vmatpush3.xpose.msra.mxu0 %v1336_v16  ;;  %941 = vmatpush3.xpose.msra.mxu1 %v237_v44  ;;  %v265_v44 = vand.u32 4294901760, %v264_v29 }
  0x51   :  { %911 = vmatprep.subr.mxu0 %v1348_v26  ;;  %942 = vmatprep.subr.mxu1 %v244_v55 }
  0x54   :  { %912 = vmatpush3.xpose.msra.mxu0 %v1348_v26  ;;  %943 = vmatpush3.xpose.msra.mxu1 %v244_v55  ;;  %v272_v55 = vand.u32 4294901760, %v271_v45 }
  0x55   :  { %913 = vmatprep.subr.mxu0 %v1360_v37  ;;  %944 = vmatprep.subr.mxu1 %v251_v1 }
  0x58   :  { %914 = vmatpush3.xpose.msra.mxu0 %v1360_v37  ;;  %945 = vmatpush3.xpose.msra.mxu1 %v251_v1 }
  0x59   :  { %915 = vmatprep.subr.mxu0 %v1374_v53  ;;  %946 = vmatprep.subr.mxu1 %v258_v28 }
  0x5c   :  { %916 = vmatpush3.xpose.msra.mxu0 %v1374_v53  ;;  %947 = vmatpush3.xpose.msra.mxu1 %v258_v28 }
  0x5d   :  { %948 = vmatprep.subr.mxu1 %v265_v44  ;;  %955 = vmatprep.subr.mxu0 %v1213_v9 }
  0x5f   :  { %918 = vmatmul.mubr.f32.vlgmr.msra.gmra.mxu0 %v156_v49 }
  0x60   :  { %949 = vmatpush3.xpose.msra.mxu1 %v265_v44  ;;  %956 = vmatpush3.xpose.msra.mxu0 %v1213_v9 }
  0x61   :  { %950 = vmatprep.subr.mxu1 %v272_v55  ;;  %957 = vmatprep.subr.mxu0 %v1216_v10 }
  0x62   :  { %987 = vmatprep.mubr.f32.mxu0 %v1280_v41 }
  0x64   :  { %951 = vmatpush3.xpose.msra.mxu1 %v272_v55  ;;  %958 = vmatpush3.xpose.msra.mxu0 %v1216_v10 }
  0x65   :  { %959 = vmatprep.subr.mxu0 %v1219_v11  ;;  %990 = vmatprep.subr.mxu1 %v1203_v3 }
  0x67   :  { %953 = vmatmul.mubr.f32.vlgmr.msra.gmra.mxu1 %v1371_v52 }
  0x68   :  { %960 = vmatpush3.xpose.msra.mxu0 %v1219_v11  ;;  %991 = vmatpush3.xpose.msra.mxu1 %v1203_v3 }
  0x69   :  { %961 = vmatprep.subr.mxu0 %v1235_v17  ;;  %992 = vmatprep.subr.mxu1 %v1205_v4 }
  0x6a   :  { %1022 = vmatprep.mubr.f32.mxu1 %v144_v43 }
  0x6c   :  { %962 = vmatpush3.xpose.msra.mxu0 %v1235_v17  ;;  %993 = vmatpush3.xpose.msra.mxu1 %v1205_v4 }
  0x6d   :  { %963 = vmatprep.subr.mxu0 %v1245_v21  ;;  %994 = vmatprep.subr.mxu1 %v1207_v5 }
  0x70   :  { %964 = vmatpush3.xpose.msra.mxu0 %v1245_v21  ;;  %995 = vmatpush3.xpose.msra.mxu1 %v1207_v5 }
  0x71   :  { %965 = vmatprep.subr.mxu0 %v1263_v32  ;;  %996 = vmatprep.subr.mxu1 %v1209_v8 }
  0x74   :  { %966 = vmatpush3.xpose.msra.mxu0 %v1263_v32  ;;  %997 = vmatpush3.xpose.msra.mxu1 %v1209_v8 }
  0x75   :  { %967 = vmatprep.subr.mxu0 %v1277_v40  ;;  %998 = vmatprep.subr.mxu1 %v1222_v12 }
  0x78   :  { %968 = vmatpush3.xpose.msra.mxu0 %v1277_v40  ;;  %999 = vmatpush3.xpose.msra.mxu1 %v1222_v12 }
  0x79   :  { %969 = vmatprep.subr.mxu0 %v1294_v48  ;;  %1000 = vmatprep.subr.mxu1 %v1242_v20 }
  0x7c   :  { %970 = vmatpush3.xpose.msra.mxu0 %v1294_v48  ;;  %1001 = vmatpush3.xpose.msra.mxu1 %v1242_v20 }
  0x7d   :  { %971 = vmatprep.subr.mxu0 %v1309_v56  ;;  %1002 = vmatprep.subr.mxu1 %v1254_v27 }
  0x80   :  { %972 = vmatpush3.xpose.msra.mxu0 %v1309_v56  ;;  %1003 = vmatpush3.xpose.msra.mxu1 %v1254_v27 }
  0x81   :  { %973 = vmatprep.subr.mxu0 %v1321_v62  ;;  %1004 = vmatprep.subr.mxu1 %v1266_v34 }
  0x84   :  { %974 = vmatpush3.xpose.msra.mxu0 %v1321_v62  ;;  %1005 = vmatpush3.xpose.msra.mxu1 %v1266_v34 }
  0x85   :  { %975 = vmatprep.subr.mxu0 %v1333_v7  ;;  %1006 = vmatprep.subr.mxu1 %v1284_v42 }
  0x88   :  { %976 = vmatpush3.xpose.msra.mxu0 %v1333_v7  ;;  %1007 = vmatpush3.xpose.msra.mxu1 %v1284_v42 }
  0x89   :  { %977 = vmatprep.subr.mxu0 %v1345_v24  ;;  %1008 = vmatprep.subr.mxu1 %v1300_v50 }
  0x8c   :  { %978 = vmatpush3.xpose.msra.mxu0 %v1345_v24  ;;  %1009 = vmatpush3.xpose.msra.mxu1 %v1300_v50 }
  0x8d   :  { %979 = vmatprep.subr.mxu0 %v1357_v36  ;;  %1010 = vmatprep.subr.mxu1 %v1312_v57 }
  0x90   :  { %980 = vmatpush3.xpose.msra.mxu0 %v1357_v36  ;;  %1011 = vmatpush3.xpose.msra.mxu1 %v1312_v57 }
  0x91   :  { %981 = vmatprep.subr.mxu0 %v1369_v51  ;;  %1012 = vmatprep.subr.mxu1 %v1324_v63 }
  0x94   :  { %982 = vmatpush3.xpose.msra.mxu0 %v1369_v51  ;;  %1013 = vmatpush3.xpose.msra.mxu1 %v1324_v63 }
  0x95   :  { %983 = vmatprep.subr.mxu0 %v1383_v61  ;;  %1014 = vmatprep.subr.mxu1 %v1336_v16 }
  0x98   :  { %984 = vmatpush3.xpose.msra.mxu0 %v1383_v61  ;;  %1015 = vmatpush3.xpose.msra.mxu1 %v1336_v16 }
  0x99   :  { %985 = vmatprep.subr.mxu0 %v1396_v19  ;;  %1016 = vmatprep.subr.mxu1 %v1348_v26 }
  0x9c   :  { %986 = vmatpush3.xpose.msra.mxu0 %v1396_v19  ;;  %1017 = vmatpush3.xpose.msra.mxu1 %v1348_v26 }
  0x9d   :  { %1018 = vmatprep.subr.mxu1 %v1360_v37  ;;  %1025 = vmatprep.subr.mxu0 %v1226_v13 }
  0x9f   :  { %988 = vmatmul.mubr.f32.vlgmr.msra.gmra.mxu0 %v1386_v0 }
  0xa0   :  { %1019 = vmatpush3.xpose.msra.mxu1 %v1360_v37  ;;  %1026 = vmatpush3.xpose.msra.mxu0 %v1226_v13 }
  0xa1   :  { %1020 = vmatprep.subr.mxu1 %v1374_v53  ;;  %1027 = vmatprep.subr.mxu0 %v1229_v14 }
  0xa2   :  { %1057 = vmatprep.mubr.f32.mxu0 %v1268_v35 }
  0xa4   :  { %1021 = vmatpush3.xpose.msra.mxu1 %v1374_v53  ;;  %1028 = vmatpush3.xpose.msra.mxu0 %v1229_v14 }
  0xa5   :  { %1029 = vmatprep.subr.mxu0 %v1232_v15  ;;  %1060 = vmatprep.subr.mxu1 %v1203_v3 }
  0xa7   :  { %1023 = vmatmul.mubr.f32.vlgmr.msra.gmra.mxu1 %v154_v23 }
  0xa8   :  { %1030 = vmatpush3.xpose.msra.mxu0 %v1232_v15  ;;  %1061 = vmatpush3.xpose.msra.mxu1 %v1203_v3 }
  0xa9   :  { %1031 = vmatprep.subr.mxu0 %v1251_v25  ;;  %1062 = vmatprep.subr.mxu1 %v1205_v4 }
  0xaa   :  { %1092 = vmatprep.mubr.f32.mxu1 %v1268_v35 }
  0xac   :  { %1032 = vmatpush3.xpose.msra.mxu0 %v1251_v25  ;;  %1063 = vmatpush3.xpose.msra.mxu1 %v1205_v4 }
  0xad   :  { %1033 = vmatprep.subr.mxu0 %v1260_v30  ;;  %1064 = vmatprep.subr.mxu1 %v1207_v5 }
  0xb0   :  { %1034 = vmatpush3.xpose.msra.mxu0 %v1260_v30  ;;  %1065 = vmatpush3.xpose.msra.mxu1 %v1207_v5 }
  0xb1   :  { %1035 = vmatprep.subr.mxu0 %v1274_v38  ;;  %1066 = vmatprep.subr.mxu1 %v1209_v8 }
  0xb4   :  { %1036 = vmatpush3.xpose.msra.mxu0 %v1274_v38  ;;  %1067 = vmatpush3.xpose.msra.mxu1 %v1209_v8  ;;  %v776_v38 = vld [vmem:[%s1564_s2] ss:$0 sm:$0xff] }
  0xb5   :  { %1037 = vmatprep.subr.mxu0 %v1291_v46  ;;  %1068 = vmatprep.subr.mxu1 %v1222_v12 }
  0xb8   :  { %1038 = vmatpush3.xpose.msra.mxu0 %v1291_v46  ;;  %1069 = vmatpush3.xpose.msra.mxu1 %v1222_v12 }
  0xb9   :  { %1039 = vmatprep.subr.mxu0 %v1306_v54  ;;  %1070 = vmatprep.subr.mxu1 %v1242_v20 }
  0xbc   :  { %1040 = vmatpush3.xpose.msra.mxu0 %v1306_v54  ;;  %1071 = vmatpush3.xpose.msra.mxu1 %v1242_v20 }
  0xbd   :  { %1041 = vmatprep.subr.mxu0 %v1318_v60  ;;  %1072 = vmatprep.subr.mxu1 %v1254_v27 }
  0xc0   :  { %1042 = vmatpush3.xpose.msra.mxu0 %v1318_v60  ;;  %1073 = vmatpush3.xpose.msra.mxu1 %v1254_v27 }
  0xc1   :  { %1043 = vmatprep.subr.mxu0 %v1330_v2  ;;  %1074 = vmatprep.subr.mxu1 %v1266_v34 }
  0xc4   :  { %1044 = vmatpush3.xpose.msra.mxu0 %v1330_v2  ;;  %1075 = vmatpush3.xpose.msra.mxu1 %v1266_v34 }
  0xc5   :  { %1045 = vmatprep.subr.mxu0 %v1342_v22  ;;  %1076 = vmatprep.subr.mxu1 %v1284_v42 }
  0xc8   :  { %1046 = vmatpush3.xpose.msra.mxu0 %v1342_v22  ;;  %1077 = vmatpush3.xpose.msra.mxu1 %v1284_v42 }
  0xc9   :  { %1047 = vmatprep.subr.mxu0 %v1354_v31  ;;  %1078 = vmatprep.subr.mxu1 %v1300_v50 }
  0xcc   :  { %1048 = vmatpush3.xpose.msra.mxu0 %v1354_v31  ;;  %1079 = vmatpush3.xpose.msra.mxu1 %v1300_v50 }
  0xcd   :  { %1049 = vmatprep.subr.mxu0 %v1366_v47  ;;  %1080 = vmatprep.subr.mxu1 %v1312_v57 }
  0xd0   :  { %1050 = vmatpush3.xpose.msra.mxu0 %v1366_v47  ;;  %1081 = vmatpush3.xpose.msra.mxu1 %v1312_v57 }
  0xd1   :  { %1051 = vmatprep.subr.mxu0 %v1380_v59  ;;  %1082 = vmatprep.subr.mxu1 %v1324_v63 }
  0xd4   :  { %1052 = vmatpush3.xpose.msra.mxu0 %v1380_v59  ;;  %1083 = vmatpush3.xpose.msra.mxu1 %v1324_v63 }
  0xd5   :  { %1053 = vmatprep.subr.mxu0 %v1393_v18  ;;  %1084 = vmatprep.subr.mxu1 %v1336_v16 }
  0xd8   :  { %1054 = vmatpush3.xpose.msra.mxu0 %v1393_v18  ;;  %1085 = vmatpush3.xpose.msra.mxu1 %v1336_v16 }
  0xd9   :  { %1055 = vmatprep.subr.mxu0 %v1404_v33  ;;  %1086 = vmatprep.subr.mxu1 %v1348_v26 }
  0xdc   :  { %1056 = vmatpush3.xpose.msra.mxu0 %v1404_v33  ;;  %1087 = vmatpush3.xpose.msra.mxu1 %v1348_v26 }
  0xdd   :  { %1088 = vmatprep.subr.mxu1 %v1360_v37 }
  0xdf   :  { %1058 = vmatmul.mubr.f32.vlgmr.msra.gmra.mxu0 %v1371_v52 }
  0xe0   :  { %1089 = vmatpush3.xpose.msra.mxu1 %v1360_v37 }
  0xe1   :  { %1090 = vmatprep.subr.mxu1 %v1374_v53 }
  0xe4   :  { %1091 = vmatpush3.xpose.msra.mxu1 %v1374_v53 }
  0xe7   :  { %1093 = vmatmul.mubr.f32.vlgmr.msra.gmra.mxu1 %v1371_v52 }
 0x11f   :  { %v919_v3 = vpop.f32.mrf.mxu0 }
 0x121   :  { %v148_v4 = vpop.f32.mrf.mxu0 }
 0x127   :  { %v954_v5 = vpop.f32.mrf.mxu1 }
 0x128   :  { %v316_v12 = vadd.f32 %v954_v5, %v919_v3 }
 0x129   :  { %v309_v9 = vpop.f32.mrf.mxu1 }
 0x12a   :  { %v310_v14 = vadd.f32 %v309_v9, %v148_v4 }
 0x15f   :  { %v989_v8 = vpop.f32.mrf.mxu0 }
 0x160   :  { %v427_v15 = vadd.f32 %v989_v8, %v316_v12 }
 0x161   :  { %v419_v10 = vpop.f32.mrf.mxu0 }
 0x162   :  { %v420_v20 = vadd.f32 %v419_v10, %v310_v14 }
 0x167   :  { %v1024_v11 = vpop.f32.mrf.mxu1 }
 0x168   :  { %v524_v21 = vadd.f32 %v1024_v11, %v427_v15 }
 0x169   :  { %v515_v17 = vpop.f32.mrf.mxu1 }
 0x16a   :  { %v516_v27 = vadd.f32 %v515_v17, %v420_v20 }
 0x19f   :  { %v1059_v13 = vpop.f32.mrf.mxu0 }
 0x1a0   :  { %v649_v30 = vadd.f32 %v1059_v13, %v524_v21 }
 0x1a1   :  { %v642_v25 = vpop.f32.mrf.mxu0 }
 0x1a2   :  { %v643_v34 = vadd.f32 %v642_v25, %v516_v27 }
 0x1a7   :  { %v1094_v32 = vpop.f32.mrf.mxu1 }
 0x1a8   :  { %v742_v35 = vadd.f32 %v1094_v32, %v649_v30 }
 0x1a9   :  { %v735_v40 = vpop.f32.mrf.mxu1 }
 0x1aa   :  { %v746_v41 = vmul.f32 0.088388346, %v742_v35  ;;  %v736_v42 = vadd.f32 %v735_v40, %v643_v34 }
 0x1ac   :  { %v755_v43 = vadd.f32 %v776_v38, %v746_v41  ;;  %v745_v46 = vmul.f32 0.088388346, %v736_v42 }
 0x1ae   :  { %757 = vst [vmem:[#allocation7 + $0x8] sm:$0xff] %v755_v43  ;;  %v754_v48 = vadd.f32 %v776_v38, %v745_v46 }
 0x1b0   :  { %756 = vst [vmem:[#allocation7] sm:$0xff] %v754_v48 }
 0x1b1   :  { %1151 = shalt.err (!%p1148_p0)
}
 0x1b2   :  { %769 = dma.vmem_to_hbm [thread:$0]  %s764_s25, 256, %s1565_s3, [#allocation4], %s1167_s15, %s1167_s15, %s1168_s16  }
 0x1b3   :  { %1164 = dma.done.wait [#allocation4], 256  }
 0x1b4   :  { %1165 = vsyncadd [#allocation4], 4294967040 }
 0x1b5   :  { %773 = vsyncpa [#allocation3], 1 }
 0x1b6   :  { %774 = vsyncpa [#allocation6], 1 }
 0x1b7   :  { %775 = vsyncpa [#allocation4], 1 }

</bundles_post_ra>
